<compile_context>
chip_gen: v7x
topology: tpu7x:2x2x1
jax: 0.10.0
libtpu: 0.0.40
codegen_flags: <defaults>
</compile_context>

<pallas_src>
import functools
import math

import jax
import jax.numpy as jnp
from jax.experimental import pallas as pl
from jax.experimental.pallas import tpu as pltpu


# ----------------------------- helpers ------------------------------------

def _gelu_new(y):
    c = 0.7978845608028654
    return 0.5 * y * (1.0 + jnp.tanh(c * (y + 0.044715 * y * y * y)))


def _layernorm_f32(x, g, b, eps):
    mu = jnp.mean(x, axis=-1, keepdims=True)
    var = jnp.mean(jnp.square(x - mu), axis=-1, keepdims=True)
    return (x - mu) * jax.lax.rsqrt(var + eps) * g + b


def _bf16(x):
    return x.astype(jnp.bfloat16)


def _pick_block_batch(B, cap=4):
    """Largest Bb<=cap dividing B that still leaves >=2 grid steps (megacore)."""
    for bb in range(min(cap, B), 1, -1):
        if B % bb == 0 and B // bb >= 2:
            return bb
    return 1


# ------------------------- fused transformer block -------------------------

def _block_kernel(x_ref, mask_ref,
                  ln1_g_ref, ln1_b_ref, w_qkv_ref, b_qkv_ref, w_o_ref, b_o_ref,
                  ln2_g_ref, ln2_b_ref, w_fc_ref, b_fc_ref, w_proj_ref, b_proj_ref,
                  o_ref, *, n_head, causal, eps):
    """Fused pre-LN transformer block for a (Bb, T, D) batch slab."""
    Bb, T, D = x_ref.shape
    Dh = D // n_head
    scale = 1.0 / math.sqrt(Dh)

    # Residual stream stays f32; big matmuls run bf16 on MXU with f32 accumulate.
    x = x_ref[...].astype(jnp.float32).reshape(Bb * T, D)

    # ---- LN1 + fused QKV over the whole (Bb*T) slab (keeps MXU rows full) ----
    h = _layernorm_f32(x, ln1_g_ref[...], ln1_b_ref[...], eps)
    qkv = jnp.dot(h.astype(jnp.bfloat16), w_qkv_ref[...],
                  preferred_element_type=jnp.float32) + b_qkv_ref[...]   # [Bb*T, 3D]
    qkv = qkv.reshape(Bb, T, 3 * D)

    if causal:
        row = jax.lax.broadcasted_iota(jnp.int32, (T, T), 0)
        col = jax.lax.broadcasted_iota(jnp.int32, (T, T), 1)
        causal_bias = jnp.where(col <= row, 0.0, -1e9)                   # [T, T]

    # ---- multi-head attention (per element); heads concatenated then ONE ----
    # ---- out-projection matmul over the full (Bb*T, D) slab             ----
    attn_rows = []
    for b in range(Bb):
        pad = (1.0 - mask_ref[b].astype(jnp.float32)) * -1e9             # [1, T]
        bias = (pad + causal_bias) if causal else pad
        qkv_b = qkv[b]                                                   # [T, 3D]
        head_outs = []
        for hd in range(n_head):
            # scale folded into q (T*Dh multiplies instead of T*T)
            qh = (qkv_b[:, hd * Dh:(hd + 1) * Dh] * scale).astype(jnp.bfloat16)
            kh = qkv_b[:, D + hd * Dh:D + (hd + 1) * Dh].astype(jnp.bfloat16)
            vh = qkv_b[:, 2 * D + hd * Dh:2 * D + (hd + 1) * Dh].astype(jnp.bfloat16)
            s = jnp.dot(qh, kh.T, preferred_element_type=jnp.float32) + bias
            m = jnp.max(s, axis=-1, keepdims=True)
            p = jnp.exp(s - m)
            p = p * pl.reciprocal(jnp.sum(p, axis=-1, keepdims=True), approx=True)
            head_outs.append(jnp.dot(p.astype(jnp.bfloat16), vh,
                                     preferred_element_type=jnp.float32))  # [T, Dh]
        attn_rows.append(jnp.concatenate(head_outs, axis=-1))             # [T, D]
    attn = attn_rows[0] if Bb == 1 else jnp.concatenate(attn_rows, axis=0)

    attn_proj = jnp.dot(attn.astype(jnp.bfloat16), w_o_ref[...],
                        preferred_element_type=jnp.float32) + b_o_ref[...]
    x = x + attn_proj                                                      # residual

    # ---- LN2 + MLP (gelu_new) + residual ----
    h = _layernorm_f32(x, ln2_g_ref[...], ln2_b_ref[...], eps)
    hmid = jnp.dot(h.astype(jnp.bfloat16), w_fc_ref[...],
                   preferred_element_type=jnp.float32) + b_fc_ref[...]
    hmid = _gelu_new(hmid)
    y = jnp.dot(hmid.astype(jnp.bfloat16), w_proj_ref[...],
                preferred_element_type=jnp.float32) + b_proj_ref[...]
    o_ref[...] = (x + y).reshape(Bb, T, D).astype(o_ref.dtype)


def transformer_block(x, mask, p, n_head, causal, eps):
    """x: [B, T, D] f32 residual stream; mask: [B, 1, T] f32 key-padding mask."""
    B, T, D = x.shape
    Dm = p["w_fc"].shape[1]
    Bb = _pick_block_batch(B)

    def cspec(a):  # full-array block, constant index map (weight broadcast)
        return pl.BlockSpec(a.shape, lambda *_: (0,) * a.ndim)

    cost = pl.CostEstimate(
        flops=int(B * (2 * T * D * (4 * D + 2 * Dm) + 4 * T * T * D)),
        transcendentals=int(B * (n_head * T * T + T * Dm)),
        bytes_accessed=int(2 * B * T * D * 4 + (4 * D * D + 2 * D * Dm) * 2))

    return pl.pallas_call(
        functools.partial(_block_kernel, n_head=n_head, causal=causal, eps=eps),
        grid=(B // Bb,),
        in_specs=[pl.BlockSpec((Bb, T, D), lambda g: (g, 0, 0)),
                  pl.BlockSpec((Bb, 1, T), lambda g: (g, 0, 0)),
                  cspec(p["ln1_g"]), cspec(p["ln1_b"]),
                  cspec(p["w_qkv"]), cspec(p["b_qkv"]),
                  cspec(p["w_o"]), cspec(p["b_o"]),
                  cspec(p["ln2_g"]), cspec(p["ln2_b"]),
                  cspec(p["w_fc"]), cspec(p["b_fc"]),
                  cspec(p["w_proj"]), cspec(p["b_proj"])],
        out_specs=pl.BlockSpec((Bb, T, D), lambda g: (g, 0, 0)),
        out_shape=jax.ShapeDtypeStruct((B, T, D), jnp.float32),
        compiler_params=pltpu.CompilerParams(
            dimension_semantics=("parallel",),          # batch across TCs (v7x)
            vmem_limit_bytes=64 * 1024 * 1024),         # above v5e/v6e scoped default
        cost_estimate=cost,
    )(x, mask, p["ln1_g"], p["ln1_b"], p["w_qkv"], p["b_qkv"],
      p["w_o"], p["b_o"], p["ln2_g"], p["ln2_b"],
      p["w_fc"], p["b_fc"], p["w_proj"], p["b_proj"])


# ------------------------------ small linears ------------------------------

def _linear_kernel(x_ref, w_ref, b_ref, o_ref):
    y = jnp.dot(x_ref[...].astype(jnp.bfloat16), w_ref[...],
                preferred_element_type=jnp.float32) + b_ref[...]
    o_ref[...] = y.astype(o_ref.dtype)


def linear(x, w, b):
    """Single small linear (patch embedding).  w is bf16, b is [1, N] f32."""
    M, K = x.shape
    N = w.shape[1]
    return pl.pallas_call(
        _linear_kernel,
        grid=(1,),
        in_specs=[pl.BlockSpec((M, K), lambda i: (0, 0)),
                  pl.BlockSpec((K, N), lambda i: (0, 0)),
                  pl.BlockSpec((1, N), lambda i: (0, 0))],
        out_specs=pl.BlockSpec((M, N), lambda i: (0, 0)),
        out_shape=jax.ShapeDtypeStruct((M, N), jnp.float32),
    )(x, w, b)


def _cls_proj_kernel(x_ref, g_ref, b_ref, w1_ref, b1_ref, w2_ref, b2_ref, o_ref,
                     *, eps):
    """Fused: DINO final layernorm (CLS rows only) -> Linear -> ReLU -> Linear."""
    x = x_ref[...].astype(jnp.float32)
    h = _layernorm_f32(x, g_ref[...], b_ref[...], eps)
    h = jnp.dot(h.astype(jnp.bfloat16), w1_ref[...],
                preferred_element_type=jnp.float32) + b1_ref[...]
    h = jnp.maximum(h, 0.0)
    y = jnp.dot(h.astype(jnp.bfloat16), w2_ref[...],
                preferred_element_type=jnp.float32) + b2_ref[...]
    o_ref[...] = y.astype(o_ref.dtype)


def cls_proj(cls_feat, g, b, w1, b1, w2, b2, eps=1e-6):
    B, D = cls_feat.shape
    Hh = w1.shape[1]
    N = w2.shape[1]
    return pl.pallas_call(
        functools.partial(_cls_proj_kernel, eps=eps),
        grid=(1,),
        in_specs=[pl.BlockSpec((B, D), lambda i: (0, 0)),
                  pl.BlockSpec((1, D), lambda i: (0, 0)),
                  pl.BlockSpec((1, D), lambda i: (0, 0)),
                  pl.BlockSpec((D, Hh), lambda i: (0, 0)),
                  pl.BlockSpec((1, Hh), lambda i: (0, 0)),
                  pl.BlockSpec((Hh, N), lambda i: (0, 0)),
                  pl.BlockSpec((1, N), lambda i: (0, 0))],
        out_specs=pl.BlockSpec((B, N), lambda i: (0, 0)),
        out_shape=jax.ShapeDtypeStruct((B, N), jnp.float32),
    )(cls_feat, g, b, w1, b1, w2, b2)


# --------------------- tied LM head + cross-entropy ------------------------

def _lmhead_ce_kernel(h_ref, lab_ref, valid_ref, g_ref, b_ref, wte_ref, o_ref,
                      hn_sc, m_sc, l_sc, t_sc, *, tile_v, eps):
    """Final LN + tied LM head + per-row CE, tiled (rows x vocab).

    Online logsumexp / target-logit accumulators live in VMEM scratch; the
    [N, V] logits matrix is never materialized.  The layernormed hiddens are
    cached once per row slab in a bf16 scratch (no per-tile recast)."""
    j = pl.program_id(1)

    @pl.when(j == 0)
    def _():
        x = h_ref[...].astype(jnp.float32)
        hn_sc[...] = _layernorm_f32(x, g_ref[...], b_ref[...], eps).astype(jnp.bfloat16)
        m_sc[...] = jnp.full(m_sc.shape, -1e30, m_sc.dtype)
        l_sc[...] = jnp.zeros(l_sc.shape, l_sc.dtype)
        t_sc[...] = jnp.zeros(t_sc.shape, t_sc.dtype)

    # logits tile [tile_n, tile_v] = hn @ wte_tile^T (contract over D; wte bf16)
    logits = jax.lax.dot_general(
        hn_sc[...], wte_ref[...],
        dimension_numbers=(((1,), (1,)), ((), ())),
        preferred_element_type=jnp.float32)

    # target-logit contribution from this vocab tile
    ids = jax.lax.broadcasted_iota(jnp.int32, logits.shape, 1) + j * tile_v
    onehot = (ids == lab_ref[...]).astype(jnp.float32)
    t_sc[...] += jnp.sum(logits * onehot, axis=-1, keepdims=True)

    # online logsumexp update
    m_new = jnp.maximum(m_sc[...], jnp.max(logits, axis=-1, keepdims=True))
    alpha = jnp.exp(m_sc[...] - m_new)
    l_sc[...] = alpha * l_sc[...] + jnp.sum(jnp.exp(logits - m_new),
                                            axis=-1, keepdims=True)
    m_sc[...] = m_new

    @pl.when(j == pl.num_programs(1) - 1)
    def _():
        lse = m_sc[...] + jnp.log(l_sc[...])
        o_ref[...] = (lse - t_sc[...]) * valid_ref[...]   # per-row loss (0 on pad rows)


def lm_head_ce(h, labels, g, b, wte_bf16, *, tile_n=256, tile_v=512, eps=1e-5):
    """h: [N, D] pre-final-LN hiddens; labels: [N] int; wte_bf16: [V, D] bf16."""
    N, D = h.shape
    V = wte_bf16.shape[0]
    tile_v = min(tile_v, V)
    assert V % tile_v == 0

    # pad rows to a sublane/tile_n multiple; padded rows contribute 0 to the loss
    n_pad = -(-N // 8) * 8
    tile_n = min(tile_n, n_pad)
    n_pad = -(-n_pad // tile_n) * tile_n
    if n_pad != N:
        h = jnp.pad(h, ((0, n_pad - N), (0, 0)))
        labels = jnp.pad(labels, (0, n_pad - N), constant_values=-1)
    valid = (jnp.arange(n_pad) < N).astype(jnp.float32).reshape(n_pad, 1)
    labels2 = labels.reshape(n_pad, 1).astype(jnp.int32)

    cost = pl.CostEstimate(flops=int(2 * N * D * V),
                           transcendentals=int(N * V),
                           bytes_accessed=int(N * D * 4 + V * D * 2 + N * 8))

    per_row = pl.pallas_call(
        functools.partial(_lmhead_ce_kernel, tile_v=tile_v, eps=eps),
        grid=(n_pad // tile_n, V // tile_v),
        in_specs=[pl.BlockSpec((tile_n, D), lambda i, j: (i, 0)),
                  pl.BlockSpec((tile_n, 1), lambda i, j: (i, 0)),
                  pl.BlockSpec((tile_n, 1), lambda i, j: (i, 0)),
                  pl.BlockSpec((1, D), lambda i, j: (0, 0)),
                  pl.BlockSpec((1, D), lambda i, j: (0, 0)),
                  pl.BlockSpec((tile_v, D), lambda i, j: (j, 0))],
        out_specs=pl.BlockSpec((tile_n, 1), lambda i, j: (i, 0)),
        out_shape=jax.ShapeDtypeStruct((n_pad, 1), jnp.float32),
        scratch_shapes=[pltpu.VMEM((tile_n, D), jnp.bfloat16),
                        pltpu.VMEM((tile_n, 1), jnp.float32),
                        pltpu.VMEM((tile_n, 1), jnp.float32),
                        pltpu.VMEM((tile_n, 1), jnp.float32)],
        compiler_params=pltpu.CompilerParams(
            dimension_semantics=("parallel", "arbitrary"),  # rows x vocab-reduction
            vmem_limit_bytes=64 * 1024 * 1024),
        cost_estimate=cost,
    )(h, labels2, valid, g, b, wte_bf16)
    # HF GPT2 CE: mean over all B*(T-1) positions (labels carry no -100 here).
    return jnp.sum(per_row) / N


# --------------------------- model composition -----------------------------

def dino_forward(images, p):
    """Tiny ViT standing in for frozen DINOv2; returns pre-LN CLS features [B, D]."""
    B, C, H, W = images.shape
    ps = p["patch_size"]
    nh, nw = H // ps, W // ps
    patches = images.reshape(B, C, nh, ps, nw, ps)
    patches = patches.transpose(0, 2, 4, 1, 3, 5).reshape(B * nh * nw, C * ps * ps)
    tok = linear(patches, p["w_patch"], p["b_patch"]).reshape(B, nh * nw, -1)
    D = tok.shape[-1]
    cls = jnp.broadcast_to(p["cls"], (B, 1, D))
    x = jnp.concatenate([cls, tok], axis=1) + p["pos"]
    T = x.shape[1]
    mask = jnp.ones((B, 1, T), jnp.float32)             # bidirectional, no padding
    for blk in p["blocks"]:
        x = transformer_block(x, mask, blk, p["n_head"], causal=False, eps=1e-6)
    return x[:, 0, :]                                    # CLS (final LN fused later)


def gpt_loss(image_emb, input_ids, attention_mask, p):
    """GPT2-style causal LM loss given prepended image embedding."""
    B, T = input_ids.shape
    D = p["wte"].shape[1]
    tok_emb = jnp.take(p["wte"], input_ids, axis=0).astype(jnp.float32)   # [B,T,D]
    inputs_embeds = jnp.concatenate([image_emb, tok_emb[:, :-1, :]], axis=1)
    attn_mask = jnp.concatenate(
        [jnp.ones((B, 1), jnp.float32), attention_mask[:, :-1].astype(jnp.float32)],
        axis=1)[:, None, :]                                               # [B,1,T]
    x = inputs_embeds + p["wpe"][:T][None]
    for blk in p["blocks"]:
        x = transformer_block(x, attn_mask, blk, p["n_head"], causal=True, eps=1e-5)
    # HF GPT2LMHeadModel label shift: logits[..., :-1, :] vs labels[..., 1:]
    h_shift = x[:, :T - 1, :].reshape(B * (T - 1), D)
    shift_labels = input_ids[:, 1:].reshape(B * (T - 1))
    return lm_head_ce(h_shift, shift_labels, p["lnf_g"], p["lnf_b"], p["wte"])


def dino_gpt_forward(params, images, input_ids, attention_mask):
    cls_feat = dino_forward(images, params["dino"])                       # [B, Dd]
    pd, pr = params["dino"], params["proj"]
    image_emb = cls_proj(cls_feat, pd["lnf_g"], pd["lnf_b"],
                         pr["w1"], pr["b1"], pr["w2"], pr["b2"])          # [B, De]
    image_emb = image_emb[:, None, :]                                     # unsqueeze(1)
    return gpt_loss(image_emb, input_ids, attention_mask, params["gpt"])


# ------------------------------ param init ---------------------------------

def init_block(key, d, d_mlp):
    ks = jax.random.split(key, 4)
    std = 0.02
    return dict(
        ln1_g=jnp.ones((1, d), jnp.float32), ln1_b=jnp.zeros((1, d), jnp.float32),
        w_qkv=_bf16(std * jax.random.normal(ks[0], (d, 3 * d), jnp.float32)),
        b_qkv=jnp.zeros((1, 3 * d), jnp.float32),
        w_o=_bf16(std * jax.random.normal(ks[1], (d, d), jnp.float32)),
        b_o=jnp.zeros((1, d), jnp.float32),
        ln2_g=jnp.ones((1, d), jnp.float32), ln2_b=jnp.zeros((1, d), jnp.float32),
        w_fc=_bf16(std * jax.random.normal(ks[2], (d, d_mlp), jnp.float32)),
        b_fc=jnp.zeros((1, d_mlp), jnp.float32),
        w_proj=_bf16(std * jax.random.normal(ks[3], (d_mlp, d), jnp.float32)),
        b_proj=jnp.zeros((1, d), jnp.float32),
    )


if __name__ == "__main__":
    key = jax.random.PRNGKey(0)
    B, C, H, W = 4, 3, 16, 16
    patch = 8
    d_dino = 64       # stand-in for dino.config.hidden_size
    n_embd = 64       # stand-in for gpt.config.n_embd
    vocab = 256       # vocab (clamped 256-wide vocab tile)
    T = 8             # caption token length after tokenization
    n_head = 4
    n_layer = 2
    n_patch_tok = (H // patch) * (W // patch) + 1

    keys = jax.random.split(key, 16)
    dino = dict(
        patch_size=patch, n_head=n_head,
        w_patch=_bf16(0.02 * jax.random.normal(keys[0], (C * patch * patch, d_dino),
                                               jnp.float32)),
        b_patch=jnp.zeros((1, d_dino), jnp.float32),
        cls=0.02 * jax.random.normal(keys[1], (1, 1, d_dino), jnp.float32),
        pos=0.02 * jax.random.normal(keys[2], (1, n_patch_tok, d_dino), jnp.float32),
        blocks=[init_block(keys[3 + i], d_dino, 4 * d_dino) for i in range(n_layer)],
        lnf_g=jnp.ones((1, d_dino), jnp.float32),
        lnf_b=jnp.zeros((1, d_dino), jnp.float32),
    )
    proj = dict(
        w1=_bf16(0.02 * jax.random.normal(keys[6], (d_dino, n_embd), jnp.float32)),
        b1=jnp.zeros((1, n_embd), jnp.float32),
        w2=_bf16(0.02 * jax.random.normal(keys[7], (n_embd, n_embd), jnp.float32)),
        b2=jnp.zeros((1, n_embd), jnp.float32),
    )
    gpt = dict(
        n_head=n_head,
        # tied embedding / LM-head table stored bf16 (cast once at init)
        wte=_bf16(0.02 * jax.random.normal(keys[8], (vocab, n_embd), jnp.float32)),
        wpe=0.01 * jax.random.normal(keys[9], (T, n_embd), jnp.float32),
        blocks=[init_block(keys[10 + i], n_embd, 4 * n_embd) for i in range(n_layer)],
        lnf_g=jnp.ones((1, n_embd), jnp.float32),
        lnf_b=jnp.zeros((1, n_embd), jnp.float32),
    )
    params = dict(dino=dino, proj=proj, gpt=gpt)

    images = jax.random.normal(keys[14], (B, C, H, W), jnp.float32)
    input_ids = jax.random.randint(keys[15], (B, T), 0, vocab, dtype=jnp.int32)
    attention_mask = jnp.array([[1] * T,
                                [1] * (T - 2) + [0] * 2,
                                [1] * (T - 1) + [0] * 1,
                                [1] * (T - 3) + [0] * 3], dtype=jnp.int32)

    loss = dino_gpt_forward(params, images, input_ids, attention_mask)
    loss = jax.block_until_ready(loss)
    assert loss.shape == () and bool(jnp.isfinite(loss))
    print("KERNEL_OK")
</pallas_src>

<mosaic_0001>
module attributes {stable_mosaic.version = 11 : i64} {
  func.func @_linear_kernel(%arg0: i32, %arg1: memref<16x192xf32, #tpu.memory_space<vmem>>, %arg2: memref<192x64xbf16, #tpu.memory_space<vmem>>, %arg3: memref<1x64xf32, #tpu.memory_space<vmem>>, %arg4: memref<16x64xf32, #tpu.memory_space<vmem>>) attributes {dimension_semantics = [#tpu.dimension_semantics<arbitrary>], iteration_bounds = array<i64: 1>, scalar_prefetch = 0 : i64, scratch_operands = 0 : i64, tpu.core_type = #tpu.core_type<tc>, window_params = [{pipeline_mode = #tpu.pipeline_mode<synchronous>, transform_indices = @transform_0, window_bounds = array<i64: 16, 192>}, {pipeline_mode = #tpu.pipeline_mode<synchronous>, transform_indices = @transform_1, window_bounds = array<i64: 192, 64>}, {pipeline_mode = #tpu.pipeline_mode<synchronous>, transform_indices = @transform_2, window_bounds = array<i64: 1, 64>}, {pipeline_mode = #tpu.pipeline_mode<synchronous>, transform_indices = @transform_3, window_bounds = array<i64: 16, 64>}]} {
    %c0 = arith.constant 0 : index
    %c0_0 = arith.constant 0 : index
    %0 = vector.load %arg1[%c0, %c0_0] : memref<16x192xf32, #tpu.memory_space<vmem>>, vector<16x192xf32>
    %1 = arith.truncf %0 : vector<16x192xf32> to vector<16x192xbf16>
    %c0_1 = arith.constant 0 : index
    %c0_2 = arith.constant 0 : index
    %2 = vector.load %arg2[%c0_1, %c0_2] : memref<192x64xbf16, #tpu.memory_space<vmem>>, vector<192x64xbf16>
    %cst = arith.constant dense<0.000000e+00> : vector<16x64xf32>
    %3 = tpu.matmul %1, %2, %cst {dimension_numbers = #tpu.dot_dimension_numbers<[1], [0], [0], [1], [0, 0, 1, 1], [], []>} : vector<16x192xbf16>, vector<192x64xbf16>, vector<16x64xf32> -> vector<16x64xf32>
    %c0_3 = arith.constant 0 : index
    %c0_4 = arith.constant 0 : index
    %4 = vector.load %arg3[%c0_3, %c0_4] : memref<1x64xf32, #tpu.memory_space<vmem>>, vector<1x64xf32>
    %5 = vector.broadcast %4 : vector<1x64xf32> to vector<16x64xf32>
    %6 = arith.addf %3, %5 : vector<16x64xf32>
    %c0_5 = arith.constant 0 : index
    %c0_6 = arith.constant 0 : index
    %7 = vector.load %arg4[%c0_5, %c0_6] : memref<16x64xf32, #tpu.memory_space<vmem>>, vector<16x64xf32>
    tpu.vector_store %arg4[%c0_5, %c0_6], %6 {strides = array<i32>} : memref<16x64xf32, #tpu.memory_space<vmem>>, vector<16x64xf32>,
    return
  }
  func.func @transform_0(%arg0: i32) -> (i32, i32) {
    %c0_i32 = arith.constant 0 : i32
    %c0_i32_0 = arith.constant 0 : i32
    %c0_i32_1 = arith.constant 0 : i32
    return %c0_i32, %c0_i32_0 : i32, i32
  }
  func.func @transform_1(%arg0: i32) -> (i32, i32) {
    %c0_i32 = arith.constant 0 : i32
    %c0_i32_0 = arith.constant 0 : i32
    %c0_i32_1 = arith.constant 0 : i32
    return %c0_i32, %c0_i32_0 : i32, i32
  }
  func.func @transform_2(%arg0: i32) -> (i32, i32) {
    %c0_i32 = arith.constant 0 : i32
    %c0_i32_0 = arith.constant 0 : i32
    %c0_i32_1 = arith.constant 0 : i32
    return %c0_i32, %c0_i32_0 : i32, i32
  }
  func.func @transform_3(%arg0: i32) -> (i32, i32) {
    %c0_i32 = arith.constant 0 : i32
    %c0_i32_0 = arith.constant 0 : i32
    %c0_i32_1 = arith.constant 0 : i32
    return %c0_i32, %c0_i32_0 : i32, i32
  }
}

</mosaic_0001>

<bundles_post_ra>
// kernel: tpu_custom_call.1
= control target key start
LH: loop header
LB: loop body
LE: loop exit
PB: predicated region body
PF: predicated region fallthrough
CT: control target
= control target key end

     0   :  { %v242_v1 = vmov 0   ;;  %vm125_vm0 = vcmask 523264   ;;  %s332_s0 = inlined_call_operand.vmem [shape: f32[16,192], index: 0, kind: input, shape index: {}]   ;;  %s333_s1 = inlined_call_operand.vmem [shape: bf16[192,64], index: 1, kind: input, shape index: {}]   ;;  %s334_s2 = inlined_call_operand.vmem [shape: f32[1,64], index: 2, kind: input, shape index: {}]   ;;  %s335_s3 = inlined_call_operand.hbm [shape: f32[16,64], index: 3, kind: output, shape index: {}]  }
   0x1   :  { %v206_v0 = vld [vmem:[%s333_s1] sm:$0xff]   ;;  %129 = vmatprep.subr.bf16.mxu0 %v242_v1  ;;  %v207_v2 = vld [vmem:[%s333_s1 + $0x8] sm:$0xff]   ;;  %v208_v3 = vld [vmem:[%s333_s1 + $0x10] sm:$0xff]  }
   0x2   :  { %130 = vmatpush1.bf16.msra.mxu0 %v206_v0  ;;  %v209_v4 = vld [vmem:[%s333_s1 + $0x18] sm:$0xff]   ;;  %v17_v5 = vld [vmem:[%s332_s0 + $0x8] sm:$0xff] }
   0x3   :  { %131 = vmatprep.subr.bf16.mxu0 %v242_v1  ;;  %v19_v6 = vld [vmem:[%s332_s0 + $0x18] sm:$0xff] }
   0x4   :  { %v21_v7 = vpack.c.bf16 %v19_v6, %v17_v5 }
   0x6   :  { %132 = vmatpush1.bf16.msra.mxu0 %v207_v2 }
   0x7   :  { %133 = vmatprep.subr.bf16.mxu0 %v242_v1 }
   0xa   :  { %134 = vmatpush1.bf16.msra.mxu0 %v208_v3 }
   0xb   :  { %135 = vmatprep.subr.bf16.mxu0 %v242_v1 }
   0xc   :  { %8 = vsyncpa [#allocation3], 0  ;;  %v210_v8 = vld [vmem:[%s333_s1 + $0x20] sm:$0xff]   ;;  %201 = vmatprep.mubr.msk.bf16.mxu0 %vm125_vm0, %v21_v7  ;;  %v211_v9 = vld [vmem:[%s333_s1 + $0x28] sm:$0xff]   ;;  %s243_s19 = smov [#allocation2]  }
   0xd   :  { %v212_v10 = vld [vmem:[%s333_s1 + $0x30] sm:$0xff]   ;;  %v213_v11 = vld [vmem:[%s333_s1 + $0x38] sm:$0xff]   ;;  %v214_v12 = vld [vmem:[%s333_s1 + $0x40] sm:$0xff]   ;;  %s177_s20 = sshll.u32 %s243_s19, 4  ;;  %s178_s20 = int_to_ptr.vmem [resolvable:$true] %s177_s20 }
   0xe   :  { %136 = vmatpush1.bf16.msra.mxu0 %v209_v4  ;;  %v215_v13 = vld [vmem:[%s333_s1 + $0x48] sm:$0xff]   ;;  %v216_v14 = vld [vmem:[%s333_s1 + $0x50] sm:$0xff]   ;;  %v217_v15 = vld [vmem:[%s333_s1 + $0x58] sm:$0xff]   ;;  %p223_p1 = scmp.lt.s32.totalorder %s178_s20, %s178_s20 }
   0xf   :  { %137 = vmatprep.subr.bf16.mxu0 %v242_v1  ;;  %v16_v16 = vld [vmem:[%s332_s0] sm:$0xff]  ;;  %v18_v17 = vld [vmem:[%s332_s0 + $0x10] sm:$0xff]  ;;  %s218_s0 = scalar_lea.vmem %s178_s20, 256 }
  0x10   :  { %v20_v18 = vpack.c.bf16 %v18_v17, %v16_v16  ;;  %v188_v19 = vld [vmem:[%s334_s2] ss:$0 sm:$0xff]  ;;  %p219_p0 = scmp.ne.s32.totalorder %s178_s20, %s218_s0  ;;  %p224_p2 = scmp.lt.s32.totalorder %s218_s0, %s218_s0 }
  0x12   :  { %138 = vmatpush1.bf16.msra.mxu0 %v210_v8  ;;  %p225_p3 = por %p224_p2, %p223_p1 }
  0x13   :  { %139 = vmatprep.subr.bf16.mxu0 %v242_v1 }
  0x14   :  { %p226_p4 = pnand %p225_p3, %p219_p0 }
  0x16   :  { %140 = vmatpush1.bf16.msra.mxu0 %v211_v9 }
  0x17   :  { %141 = vmatprep.subr.bf16.mxu0 %v242_v1 }
  0x1a   :  { %142 = vmatpush1.bf16.msra.mxu0 %v212_v10 }
  0x1b   :  { %143 = vmatprep.subr.bf16.mxu0 %v242_v1 }
  0x1e   :  { %144 = vmatpush1.bf16.msra.mxu0 %v213_v11 }
  0x1f   :  { %145 = vmatprep.subr.bf16.mxu0 %v242_v1 }
  0x22   :  { %146 = vmatpush1.bf16.msra.mxu0 %v214_v12 }
  0x23   :  { %147 = vmatprep.subr.bf16.mxu0 %v242_v1 }
  0x26   :  { %148 = vmatpush1.bf16.msra.mxu0 %v215_v13 }
  0x27   :  { %149 = vmatprep.subr.bf16.mxu0 %v242_v1 }
  0x2a   :  { %150 = vmatpush1.bf16.msra.mxu0 %v216_v14 }
  0x2b   :  { %151 = vmatprep.subr.bf16.mxu0 %v242_v1 }
  0x2e   :  { %152 = vmatpush1.bf16.msra.mxu0 %v217_v15 }
  0x31   :  { %162 = vmatmul.mubr.bf16.vlgmr.msra.gmra.mrb[0].mxu0 %v20_v18 }
 0x104   :  { %v163_v20 = vpop.f32.mrb[0].mxu0 }
 0x105   :  { %v164_v21 = vadd.f32 %v188_v19, %v163_v20  ;;  %v165_v22 = vpop.f32.mrb[1].mxu0 }
 0x106   :  { %v166_v23 = vpop.f32.mrb[2].mxu0 }
 0x107   :  { %170 = vst.msk [vmem:[#allocation2] sm:$0xff] %vm125_vm0, %v164_v21  ;;  %v167_v24 = vadd.f32 %v188_v19, %v166_v23  ;;  %v168_v25 = vpop.f32.mrb[3].mxu0 }
 0x109   :  { %171 = vst.msk [vmem:[#allocation2 + $0x8] sm:$0xff] %vm125_vm0, %v167_v24 }
 0x10a   :  { %229 = shalt.err (!%p226_p4)
}
 0x10b   :  { %s230_s21 = scalar_lea.hbm %s335_s3, 256 }
 0x10c   :  { %p231_p5 = scmp.ne.s32.totalorder %s335_s3, %s230_s21  ;;  %p234_p6 = scmp.lt.u32.totalorder %s230_s21, %s335_s3 }
 0x10e   :  { %p236_p7 = pnand %p234_p6, %p231_p5 }
 0x110   :  { %239 = shalt.err (!%p236_p7)
}
 0x111   :  { %s244_s26 = smov 128   ;;  %s245_s27 = smov 8  }
 0x112   :  { %183 = dma.vmem_to_hbm [thread:$0]  %s178_s20, 256, %s335_s3, [#allocation3], %s244_s26, %s244_s26, %s245_s27  }
 0x113   :  { %240 = dma.done.wait [#allocation3], 256  }
 0x114   :  { %241 = vsyncadd [#allocation3], 4294967040 }
 0x115   :  { %187 = vsyncpa [#allocation3], 1 }

</bundles_post_ra>
